<compile_context>
chip_gen: v7x
topology: tpu7x:2x2x1
jax: 0.10.0
libtpu: 0.0.40
codegen_flags: <defaults>
</compile_context>

<pallas_src>
import functools

import jax
import jax.numpy as jnp
from jax.experimental import pallas as pl
from jax.experimental.pallas import tpu as pltpu


# ----------------------------- Pallas kernels -------------------------------

def cgconv_kernel(z_ref, d_ref, tgt_ref, x_ref, w_ref, b_ref, out_ref):
    """CGConv message + exp distance weight + scatter-add + residual.

    Grid = (node_tiles, edge_tiles); edge axis is the reduction ("arbitrary").
      z:   (TE, Kp)    bf16  concatenated [x_i, x_j, edge_attr] (zero padded)
      d:   (1, TE)     f32   edge distances (lane-dense)
      tgt: (1, TE)     int32 aggregation target node per edge (-1 for padding)
      x:   (TN, Cp)    f32   residual (original node features, padded)
      w:   (Kp, 2*Cp)  bf16  fused [lin_f | lin_s] weights
      b:   (1, 2*Cp)   f32   fused biases
      out: (TN, Cp)    f32   accumulated over edge tiles
    """
    e = pl.program_id(1)

    @pl.when(e == 0)
    def _():
        out_ref[...] = x_ref[...]                       # start from the residual

    # Fused lin_f / lin_s: one MXU pass over the z tile (bf16 in, f32 acc).
    fs = jnp.dot(z_ref[...], w_ref[...],
                 preferred_element_type=jnp.float32) + b_ref[...]
    cp = out_ref.shape[-1]
    msg = jax.nn.sigmoid(fs[:, :cp]) * jax.nn.softplus(fs[:, cp:])   # (TE, Cp)

    # if_exp=True: sigma=3, n=2  ->  w(d) = exp(-d^2 / 9 / 2) = exp(d*d*(-1/18)).
    # Folded into the scatter one-hot: one lane-broadcast multiply on the VPU.
    d = d_ref[...]                                      # (1, TE)
    w_d = jnp.exp(d * d * (-1.0 / 18.0))                # (1, TE)

    # Build the (TN, TE) weighted one-hot scatter tile from int32 targets.
    tn = out_ref.shape[0]
    te = z_ref.shape[0]
    node_ids = pl.program_id(0) * tn + jax.lax.broadcasted_iota(
        jnp.int32, (tn, te), 0)
    scat = jnp.where(node_ids == tgt_ref[...], w_d, 0.0).astype(jnp.bfloat16)

    # Scatter-add as a dense one-hot matmul on the MXU (f32 accumulate).
    out_ref[...] += jnp.dot(scat, msg.astype(jnp.bfloat16),
                            preferred_element_type=jnp.float32)


def edge_mlp_kernel(ze_ref, w1_ref, b1_ref, w2_ref, b2_ref, out_ref):
    """e_lin: Linear(D+2C,128) -> SiLU -> Linear(128,Do) -> SiLU (padded dims)."""
    h = jnp.dot(ze_ref[...], w1_ref[...],
                preferred_element_type=jnp.float32) + b1_ref[...]
    h = h * jax.nn.sigmoid(h)                            # SiLU in f32
    o = jnp.dot(h.astype(jnp.bfloat16), w2_ref[...],
                preferred_element_type=jnp.float32) + b2_ref[...]
    out_ref[...] = o * jax.nn.sigmoid(o)                 # SiLU (non-output layer)


# ------------------------------ MPLayer wrapper ------------------------------

def _round_up(x, m):
    return ((x + m - 1) // m) * m


@functools.partial(jax.jit, static_argnames=("num_nodes", "tile_n", "tile_e"))
def mplayer_forward(atom_fea, edge_idx, edge_fea, distance, params, *,
                    num_nodes, tile_n=1024, tile_e=512):
    """MPLayer.forward with CGConv atom update + edge update MLP."""
    C = atom_fea.shape[-1]
    D = edge_fea.shape[-1]
    E = edge_fea.shape[0]
    H = params["w1"].shape[-1]
    Do = params["w2"].shape[-1]

    src = edge_idx[0]          # edge_index[0] = source (j), flow='source_to_target'
    tgt = edge_idx[1]          # edge_index[1] = target (i) = aggregation index

    # Padded / tiled sizes (lane-dense features, sublane-aligned rows).
    Cp = _round_up(C, 128)
    Dop = _round_up(Do, 128)
    Hp = _round_up(H, 128)
    K = 2 * C + D
    Kp = _round_up(K, 128)
    TN = min(tile_n, _round_up(num_nodes, 8))
    TE = min(tile_e, _round_up(E, 8))
    Np = _round_up(num_nodes, TN)
    Ep = _round_up(E, TE)

    # -------------------------- CGConv (atom update) -------------------------
    af_bf = atom_fea.astype(jnp.bfloat16)
    z = jnp.concatenate([af_bf[tgt], af_bf[src],
                         edge_fea.astype(jnp.bfloat16)], axis=-1)       # (E, K)
    z_p = jnp.zeros((Ep, Kp), jnp.bfloat16).at[:E, :K].set(z)
    d_p = jnp.zeros((1, Ep), jnp.float32).at[0, :E].set(distance)
    # -1 targets for padded edges never match any node id -> contribute nothing.
    tgt_p = jnp.full((1, Ep), -1, jnp.int32).at[0, :E].set(tgt.astype(jnp.int32))
    x_p = jnp.zeros((Np, Cp), jnp.float32).at[:num_nodes, :C].set(atom_fea)

    # Fused [lin_f | lin_s] weights / biases, zero padded.
    w_fs = jnp.zeros((Kp, 2 * Cp), jnp.bfloat16)
    w_fs = w_fs.at[:K, :C].set(params["wf"].astype(jnp.bfloat16))
    w_fs = w_fs.at[:K, Cp:Cp + C].set(params["ws"].astype(jnp.bfloat16))
    b_fs = jnp.zeros((1, 2 * Cp), jnp.float32)
    b_fs = b_fs.at[0, :C].set(params["bf"])
    b_fs = b_fs.at[0, Cp:Cp + C].set(params["bs"])

    atom_out_p = pl.pallas_call(
        cgconv_kernel,
        out_shape=jax.ShapeDtypeStruct((Np, Cp), jnp.float32),
        grid_spec=pltpu.PrefetchScalarGridSpec(
            num_scalar_prefetch=0,
            grid=(Np // TN, Ep // TE),
            in_specs=[
                pl.BlockSpec((TE, Kp), lambda i, e: (e, 0)),       # z tile
                pl.BlockSpec((1, TE), lambda i, e: (0, e)),        # distance
                pl.BlockSpec((1, TE), lambda i, e: (0, e)),        # target idx
                pl.BlockSpec((TN, Cp), lambda i, e: (i, 0)),       # residual
                pl.BlockSpec((Kp, 2 * Cp), lambda i, e: (0, 0)),   # fused W
                pl.BlockSpec((1, 2 * Cp), lambda i, e: (0, 0)),    # fused b
            ],
            out_specs=pl.BlockSpec((TN, Cp), lambda i, e: (i, 0)),
        ),
        compiler_params=pltpu.CompilerParams(
            dimension_semantics=("parallel", "arbitrary"),
            vmem_limit_bytes=32 * 1024 * 1024),
    )(z_p, d_p, tgt_p, x_p, w_fs, b_fs)
    atom_out = atom_out_p[:num_nodes, :C]

    # --------------------------- edge update MLP ------------------------------
    # e_lin(cat([atom[row], atom[col], edge_fea])) ; row=src, col=tgt
    ao_bf = atom_out.astype(jnp.bfloat16)
    ze = jnp.concatenate([ao_bf[src], ao_bf[tgt],
                          edge_fea.astype(jnp.bfloat16)], axis=-1)
    K1 = D + 2 * C
    K1p = _round_up(K1, 128)
    ze_p = jnp.zeros((Ep, K1p), jnp.bfloat16).at[:E, :K1].set(ze)
    w1_p = jnp.zeros((K1p, Hp), jnp.bfloat16).at[:K1, :H].set(
        params["w1"].astype(jnp.bfloat16))
    b1_p = jnp.zeros((1, Hp), jnp.float32).at[0, :H].set(params["b1"])
    w2_p = jnp.zeros((Hp, Dop), jnp.bfloat16).at[:H, :Do].set(
        params["w2"].astype(jnp.bfloat16))
    b2_p = jnp.zeros((1, Dop), jnp.float32).at[0, :Do].set(params["b2"])

    edge_out_p = pl.pallas_call(
        edge_mlp_kernel,
        out_shape=jax.ShapeDtypeStruct((Ep, Dop), jnp.float32),
        grid_spec=pltpu.PrefetchScalarGridSpec(
            num_scalar_prefetch=0,
            grid=(Ep // TE,),
            in_specs=[
                pl.BlockSpec((TE, K1p), lambda e: (e, 0)),
                pl.BlockSpec((K1p, Hp), lambda e: (0, 0)),
                pl.BlockSpec((1, Hp), lambda e: (0, 0)),
                pl.BlockSpec((Hp, Dop), lambda e: (0, 0)),
                pl.BlockSpec((1, Dop), lambda e: (0, 0)),
            ],
            out_specs=pl.BlockSpec((TE, Dop), lambda e: (e, 0)),
        ),
        compiler_params=pltpu.CompilerParams(
            dimension_semantics=("parallel",),
            vmem_limit_bytes=32 * 1024 * 1024),
    )(ze_p, w1_p, b1_p, w2_p, b2_p)
    edge_out = edge_out_p[:E, :Do]

    return atom_out, edge_out


# ------------------------------ reference (JAX) ------------------------------

def mplayer_reference(atom_fea, edge_idx, edge_fea, distance, params, num_nodes):
    src, tgt = edge_idx[0], edge_idx[1]
    z = jnp.concatenate([atom_fea[tgt], atom_fea[src], edge_fea], axis=-1)
    f = z @ params["wf"] + params["bf"]
    s = z @ params["ws"] + params["bs"]
    msg = jax.nn.sigmoid(f) * jax.nn.softplus(s)
    msg = msg * jnp.exp(-(distance ** 2) / 9.0 / 2.0)[:, None]
    agg = jax.ops.segment_sum(msg, tgt, num_segments=num_nodes)
    atom_out = agg + atom_fea
    ze = jnp.concatenate([atom_out[src], atom_out[tgt], edge_fea], axis=-1)
    h = jax.nn.silu(ze @ params["w1"] + params["b1"])
    edge_out = jax.nn.silu(h @ params["w2"] + params["b2"])
    return atom_out, edge_out


# ----------------------------------- main ------------------------------------

if __name__ == "__main__":

    def lin_init(kw, kb, fan_in, fan_out):
        bound = 1.0 / (fan_in ** 0.5)
        w = jax.random.uniform(kw, (fan_in, fan_out), jnp.float32, -bound, bound)
        b = jax.random.uniform(kb, (fan_out,), jnp.float32, -bound, bound)
        return w, b

    def make_case(key, N, E, C, D, DO, H=128):
        ks = jax.random.split(key, 12)
        wf, bf = lin_init(ks[0], ks[1], 2 * C + D, C)     # CGConv.lin_f
        ws, bs = lin_init(ks[2], ks[3], 2 * C + D, C)     # CGConv.lin_s
        w1, b1 = lin_init(ks[4], ks[5], D + 2 * C, H)     # e_lin[0]
        w2, b2 = lin_init(ks[6], ks[7], H, DO)            # e_lin[2]
        params = dict(wf=wf, bf=bf, ws=ws, bs=bs, w1=w1, b1=b1, w2=w2, b2=b2)
        atom_fea = jax.random.normal(ks[8], (N, C), jnp.float32)
        edge_fea = jax.random.normal(ks[9], (E, D), jnp.float32)
        edge_idx = jax.random.randint(ks[10], (2, E), 0, N, dtype=jnp.int32)
        distance = jax.random.uniform(ks[11], (E,), jnp.float32, 0.5, 5.0)
        return params, atom_fea, edge_fea, edge_idx, distance

    C, D, DO = 32, 16, 24          # in_atom_fea_len, in_edge_fea_len, out_edge_fea_len
    key = jax.random.PRNGKey(0)
    k1, k2 = jax.random.split(key)

    # ---- case 1: tiny, single-tile grid ----
    N, E = 8, 16
    params, atom_fea, edge_fea, edge_idx, distance = make_case(k1, N, E, C, D, DO)
    atom_out, edge_out = mplayer_forward(
        atom_fea, edge_idx, edge_fea, distance, params, num_nodes=N)
    jax.block_until_ready((atom_out, edge_out))
    ref_atom, ref_edge = mplayer_reference(
        atom_fea, edge_idx, edge_fea, distance, params, N)
    assert atom_out.shape == (N, C) and edge_out.shape == (E, DO)
    assert jnp.allclose(atom_out, ref_atom, atol=5e-2, rtol=5e-2)   # bf16 MXU tolerance
    assert jnp.allclose(edge_out, ref_edge, atol=5e-2, rtol=5e-2)

    # ---- case 2: multi-tile grid (exercises node x edge accumulation + padding) ----
    N2, E2 = 48, 530
    params2, atom2, efea2, eidx2, dist2 = make_case(k2, N2, E2, C, D, DO)
    a2, e2 = mplayer_forward(atom2, eidx2, efea2, dist2, params2,
                             num_nodes=N2, tile_n=16, tile_e=128)
    jax.block_until_ready((a2, e2))
    ra2, re2 = mplayer_reference(atom2, eidx2, efea2, dist2, params2, N2)
    assert a2.shape == (N2, C) and e2.shape == (E2, DO)
    assert jnp.allclose(a2, ra2, atol=1e-1, rtol=1e-1)
    assert jnp.allclose(e2, re2, atol=1e-1, rtol=1e-1)

    print("KERNEL_OK")
</pallas_src>

<mosaic_0001>
module attributes {stable_mosaic.version = 11 : i64} {
  func.func @cgconv_kernel(%arg0: i32, %arg1: i32, %arg2: memref<16x128xbf16, #tpu.memory_space<vmem>>, %arg3: memref<1x16xf32, #tpu.memory_space<vmem>>, %arg4: memref<1x16xi32, #tpu.memory_space<vmem>>, %arg5: memref<8x128xf32, #tpu.memory_space<vmem>>, %arg6: memref<128x256xbf16, #tpu.memory_space<vmem>>, %arg7: memref<1x256xf32, #tpu.memory_space<vmem>>, %arg8: memref<8x128xf32, #tpu.memory_space<vmem>>) attributes {dimension_semantics = [#tpu.dimension_semantics<parallel>, #tpu.dimension_semantics<arbitrary>], iteration_bounds = array<i64: 1, 1>, scalar_prefetch = 0 : i64, scratch_operands = 0 : i64, tpu.core_type = #tpu.core_type<tc>, window_params = [{transform_indices = @transform_0, window_bounds = array<i64: 16, 128>}, {transform_indices = @transform_1, window_bounds = array<i64: 1, 16>}, {transform_indices = @transform_2, window_bounds = array<i64: 1, 16>}, {transform_indices = @transform_3, window_bounds = array<i64: 8, 128>}, {pipeline_mode = #tpu.pipeline_mode<synchronous>, transform_indices = @transform_4, window_bounds = array<i64: 128, 256>}, {pipeline_mode = #tpu.pipeline_mode<synchronous>, transform_indices = @transform_5, window_bounds = array<i64: 1, 256>}, {transform_indices = @transform_6, window_bounds = array<i64: 8, 128>}]} {
    %c0_i32 = arith.constant 0 : i32
    %0 = arith.cmpi eq, %arg1, %c0_i32 : i32
    %1 = arith.extui %0 : i1 to i32
    %c0_i32_0 = arith.constant 0 : i32
    %2 = arith.cmpi ne, %1, %c0_i32_0 : i32
    scf.if %2 {
      %c0_20 = arith.constant 0 : index
      %c0_21 = arith.constant 0 : index
      %53 = vector.load %arg5[%c0_20, %c0_21] : memref<8x128xf32, #tpu.memory_space<vmem>>, vector<8x128xf32>
      %c0_22 = arith.constant 0 : index
      %c0_23 = arith.constant 0 : index
      %54 = vector.load %arg8[%c0_22, %c0_23] : memref<8x128xf32, #tpu.memory_space<vmem>>, vector<8x128xf32>
      tpu.vector_store %arg8[%c0_22, %c0_23], %53 {strides = array<i32>} : memref<8x128xf32, #tpu.memory_space<vmem>>, vector<8x128xf32>,
    } else {
    }
    %c0 = arith.constant 0 : index
    %c0_1 = arith.constant 0 : index
    %3 = vector.load %arg2[%c0, %c0_1] : memref<16x128xbf16, #tpu.memory_space<vmem>>, vector<16x128xbf16>
    %c0_2 = arith.constant 0 : index
    %c0_3 = arith.constant 0 : index
    %4 = vector.load %arg6[%c0_2, %c0_3] : memref<128x256xbf16, #tpu.memory_space<vmem>>, vector<128x256xbf16>
    %cst = arith.constant dense<0.000000e+00> : vector<16x256xf32>
    %5 = tpu.matmul %3, %4, %cst {dimension_numbers = #tpu.dot_dimension_numbers<[1], [0], [0], [1], [0, 0, 1, 1], [], []>} : vector<16x128xbf16>, vector<128x256xbf16>, vector<16x256xf32> -> vector<16x256xf32>
    %c0_4 = arith.constant 0 : index
    %c0_5 = arith.constant 0 : index
    %6 = vector.load %arg7[%c0_4, %c0_5] : memref<1x256xf32, #tpu.memory_space<vmem>>, vector<1x256xf32>
    %7 = vector.broadcast %6 : vector<1x256xf32> to vector<16x256xf32>
    %8 = arith.addf %5, %7 : vector<16x256xf32>
    %9 = vector.extract_strided_slice %8 {offsets = [0, 0], sizes = [16, 128], strides = [1, 1]} : vector<16x256xf32> to vector<16x128xf32>
    %10 = arith.negf %9 : vector<16x128xf32>
    %11 = math.exp %10 : vector<16x128xf32>
    %cst_6 = arith.constant 1.000000e+00 : f32
    %12 = vector.broadcast %cst_6 : f32 to vector<16x128xf32>
    %13 = arith.addf %12, %11 : vector<16x128xf32>
    %14 = arith.divf %12, %13 : vector<16x128xf32>
    %15 = vector.extract_strided_slice %8 {offsets = [0, 128], sizes = [16, 128], strides = [1, 1]} : vector<16x256xf32> to vector<16x128xf32>
    %cst_7 = arith.constant 0.000000e+00 : f32
    %16 = vector.broadcast %cst_7 : f32 to vector<16x128xf32>
    %17 = arith.maximumf %15, %16 : vector<16x128xf32>
    %18 = vector.broadcast %cst_7 : f32 to vector<16x128xf32>
    %19 = arith.subf %15, %18 : vector<16x128xf32>
    %20 = arith.cmpf one, %19, %19 : vector<16x128xf32>
    %21 = vector.broadcast %cst_7 : f32 to vector<16x128xf32>
    %22 = arith.addf %15, %21 : vector<16x128xf32>
    %23 = math.absf %19 : vector<16x128xf32>
    %cst_8 = arith.constant 0.000000e+00 : f32
    %24 = vector.broadcast %cst_8 : f32 to vector<16x128xf32>
    %25 = arith.subf %24, %23 : vector<16x128xf32>
    %26 = math.exp %25 : vector<16x128xf32>
    %27 = math.log1p %26 : vector<16x128xf32>
    %28 = arith.addf %17, %27 : vector<16x128xf32>
    %29 = arith.select %20, %22, %28 : vector<16x128xi1>, vector<16x128xf32>
    %30 = arith.mulf %14, %29 : vector<16x128xf32>
    %c0_9 = arith.constant 0 : index
    %c0_10 = arith.constant 0 : index
    %31 = vector.load %arg3[%c0_9, %c0_10] : memref<1x16xf32, #tpu.memory_space<vmem>>, vector<1x16xf32>
    %32 = arith.mulf %31, %31 : vector<1x16xf32>
    %cst_11 = arith.constant -0.055555556 : f32
    %33 = vector.broadcast %cst_11 : f32 to vector<1x16xf32>
    %34 = arith.mulf %32, %33 : vector<1x16xf32>
    %35 = math.exp %34 : vector<1x16xf32>
    %c8_i32 = arith.constant 8 : i32
    %36 = arith.muli %arg0, %c8_i32 : i32
    %37 = tpu.iota {dimensions = array<i32: 0>} : vector<8x16xi32>
    %38 = vector.broadcast %36 : i32 to vector<8x16xi32>
    %39 = arith.addi %38, %37 : vector<8x16xi32>
    %c0_12 = arith.constant 0 : index
    %c0_13 = arith.constant 0 : index
    %40 = vector.load %arg4[%c0_12, %c0_13] : memref<1x16xi32, #tpu.memory_space<vmem>>, vector<1x16xi32>
    %41 = vector.broadcast %40 : vector<1x16xi32> to vector<8x16xi32>
    %42 = arith.cmpi eq, %39, %41 : vector<8x16xi32>
    %cst_14 = arith.constant 0.000000e+00 : f32
    %43 = vector.shape_cast %35 : vector<1x16xf32> to vector<1x16xf32>
    %44 = vector.broadcast %43 : vector<1x16xf32> to vector<8x16xf32>
    %45 = vector.broadcast %cst_14 : f32 to vector<8x16xf32>
    %46 = arith.select %42, %44, %45 : vector<8x16xi1>, vector<8x16xf32>
    %47 = arith.truncf %46 : vector<8x16xf32> to vector<8x16xbf16>
    %c0_15 = arith.constant 0 : index
    %c0_16 = arith.constant 0 : index
    %48 = vector.load %arg8[%c0_15, %c0_16] : memref<8x128xf32, #tpu.memory_space<vmem>>, vector<8x128xf32>
    %49 = arith.truncf %30 : vector<16x128xf32> to vector<16x128xbf16>
    %cst_17 = arith.constant dense<0.000000e+00> : vector<8x128xf32>
    %50 = tpu.matmul %47, %49, %cst_17 {dimension_numbers = #tpu.dot_dimension_numbers<[1], [0], [0], [1], [0, 0, 1, 1], [], []>} : vector<8x16xbf16>, vector<16x128xbf16>, vector<8x128xf32> -> vector<8x128xf32>
    %51 = arith.addf %48, %50 : vector<8x128xf32>
    %c0_18 = arith.constant 0 : index
    %c0_19 = arith.constant 0 : index
    %52 = vector.load %arg8[%c0_18, %c0_19] : memref<8x128xf32, #tpu.memory_space<vmem>>, vector<8x128xf32>
    tpu.vector_store %arg8[%c0_18, %c0_19], %51 {strides = array<i32>} : memref<8x128xf32, #tpu.memory_space<vmem>>, vector<8x128xf32>,
    return
  }
  func.func @transform_0(%arg0: i32, %arg1: i32) -> (i32, i32) {
    %c0_i32 = arith.constant 0 : i32
    %c0_i32_0 = arith.constant 0 : i32
    return %arg1, %c0_i32 : i32, i32
  }
  func.func @transform_1(%arg0: i32, %arg1: i32) -> (i32, i32) {
    %c0_i32 = arith.constant 0 : i32
    %c0_i32_0 = arith.constant 0 : i32
    return %c0_i32, %arg1 : i32, i32
  }
  func.func @transform_2(%arg0: i32, %arg1: i32) -> (i32, i32) {
    %c0_i32 = arith.constant 0 : i32
    %c0_i32_0 = arith.constant 0 : i32
    return %c0_i32, %arg1 : i32, i32
  }
  func.func @transform_3(%arg0: i32, %arg1: i32) -> (i32, i32) {
    %c0_i32 = arith.constant 0 : i32
    %c0_i32_0 = arith.constant 0 : i32
    return %arg0, %c0_i32 : i32, i32
  }
  func.func @transform_4(%arg0: i32, %arg1: i32) -> (i32, i32) {
    %c0_i32 = arith.constant 0 : i32
    %c0_i32_0 = arith.constant 0 : i32
    %c0_i32_1 = arith.constant 0 : i32
    return %c0_i32, %c0_i32_0 : i32, i32
  }
  func.func @transform_5(%arg0: i32, %arg1: i32) -> (i32, i32) {
    %c0_i32 = arith.constant 0 : i32
    %c0_i32_0 = arith.constant 0 : i32
    %c0_i32_1 = arith.constant 0 : i32
    return %c0_i32, %c0_i32_0 : i32, i32
  }
  func.func @transform_6(%arg0: i32, %arg1: i32) -> (i32, i32) {
    %c0_i32 = arith.constant 0 : i32
    %c0_i32_0 = arith.constant 0 : i32
    return %arg0, %c0_i32 : i32, i32
  }
}

module attributes {stable_mosaic.version = 11 : i64} {
  func.func @edge_mlp_kernel(%arg0: i32, %arg1: memref<16x128xbf16, #tpu.memory_space<vmem>>, %arg2: memref<128x128xbf16, #tpu.memory_space<vmem>>, %arg3: memref<1x128xf32, #tpu.memory_space<vmem>>, %arg4: memref<128x128xbf16, #tpu.memory_space<vmem>>, %arg5: memref<1x128xf32, #tpu.memory_space<vmem>>, %arg6: memref<16x128xf32, #tpu.memory_space<vmem>>) attributes {dimension_semantics = [#tpu.dimension_semantics<parallel>], iteration_bounds = array<i64: 1>, scalar_prefetch = 0 : i64, scratch_operands = 0 : i64, tpu.core_type = #tpu.core_type<tc>, window_params = [{transform_indices = @transform_0, window_bounds = array<i64: 16, 128>}, {pipeline_mode = #tpu.pipeline_mode<synchronous>, transform_indices = @transform_1, window_bounds = array<i64: 128, 128>}, {pipeline_mode = #tpu.pipeline_mode<synchronous>, transform_indices = @transform_2, window_bounds = array<i64: 1, 128>}, {pipeline_mode = #tpu.pipeline_mode<synchronous>, transform_indices = @transform_3, window_bounds = array<i64: 128, 128>}, {pipeline_mode = #tpu.pipeline_mode<synchronous>, transform_indices = @transform_4, window_bounds = array<i64: 1, 128>}, {transform_indices = @transform_5, window_bounds = array<i64: 16, 128>}]} {
    %c0 = arith.constant 0 : index
    %c0_0 = arith.constant 0 : index
    %0 = vector.load %arg1[%c0, %c0_0] : memref<16x128xbf16, #tpu.memory_space<vmem>>, vector<16x128xbf16>
    %c0_1 = arith.constant 0 : index
    %c0_2 = arith.constant 0 : index
    %1 = vector.load %arg2[%c0_1, %c0_2] : memref<128x128xbf16, #tpu.memory_space<vmem>>, vector<128x128xbf16>
    %cst = arith.constant dense<0.000000e+00> : vector<16x128xf32>
    %2 = tpu.matmul %0, %1, %cst {dimension_numbers = #tpu.dot_dimension_numbers<[1], [0], [0], [1], [0, 0, 1, 1], [], []>} : vector<16x128xbf16>, vector<128x128xbf16>, vector<16x128xf32> -> vector<16x128xf32>
    %c0_3 = arith.constant 0 : index
    %c0_4 = arith.constant 0 : index
    %3 = vector.load %arg3[%c0_3, %c0_4] : memref<1x128xf32, #tpu.memory_space<vmem>>, vector<1x128xf32>
    %4 = vector.broadcast %3 : vector<1x128xf32> to vector<16x128xf32>
    %5 = arith.addf %2, %4 : vector<16x128xf32>
    %6 = arith.negf %5 : vector<16x128xf32>
    %7 = math.exp %6 : vector<16x128xf32>
    %cst_5 = arith.constant 1.000000e+00 : f32
    %8 = vector.broadcast %cst_5 : f32 to vector<16x128xf32>
    %9 = arith.addf %8, %7 : vector<16x128xf32>
    %10 = arith.divf %8, %9 : vector<16x128xf32>
    %11 = arith.mulf %5, %10 : vector<16x128xf32>
    %12 = arith.truncf %11 : vector<16x128xf32> to vector<16x128xbf16>
    %c0_6 = arith.constant 0 : index
    %c0_7 = arith.constant 0 : index
    %13 = vector.load %arg4[%c0_6, %c0_7] : memref<128x128xbf16, #tpu.memory_space<vmem>>, vector<128x128xbf16>
    %cst_8 = arith.constant dense<0.000000e+00> : vector<16x128xf32>
    %14 = tpu.matmul %12, %13, %cst_8 {dimension_numbers = #tpu.dot_dimension_numbers<[1], [0], [0], [1], [0, 0, 1, 1], [], []>} : vector<16x128xbf16>, vector<128x128xbf16>, vector<16x128xf32> -> vector<16x128xf32>
    %c0_9 = arith.constant 0 : index
    %c0_10 = arith.constant 0 : index
    %15 = vector.load %arg5[%c0_9, %c0_10] : memref<1x128xf32, #tpu.memory_space<vmem>>, vector<1x128xf32>
    %16 = vector.broadcast %15 : vector<1x128xf32> to vector<16x128xf32>
    %17 = arith.addf %14, %16 : vector<16x128xf32>
    %18 = arith.negf %17 : vector<16x128xf32>
    %19 = math.exp %18 : vector<16x128xf32>
    %cst_11 = arith.constant 1.000000e+00 : f32
    %20 = vector.broadcast %cst_11 : f32 to vector<16x128xf32>
    %21 = arith.addf %20, %19 : vector<16x128xf32>
    %22 = arith.divf %20, %21 : vector<16x128xf32>
    %23 = arith.mulf %17, %22 : vector<16x128xf32>
    %c0_12 = arith.constant 0 : index
    %c0_13 = arith.constant 0 : index
    %24 = vector.load %arg6[%c0_12, %c0_13] : memref<16x128xf32, #tpu.memory_space<vmem>>, vector<16x128xf32>
    tpu.vector_store %arg6[%c0_12, %c0_13], %23 {strides = array<i32>} : memref<16x128xf32, #tpu.memory_space<vmem>>, vector<16x128xf32>,
    return
  }
  func.func @transform_0(%arg0: i32) -> (i32, i32) {
    %c0_i32 = arith.constant 0 : i32
    %c0_i32_0 = arith.constant 0 : i32
    return %arg0, %c0_i32 : i32, i32
  }
  func.func @transform_1(%arg0: i32) -> (i32, i32) {
    %c0_i32 = arith.constant 0 : i32
    %c0_i32_0 = arith.constant 0 : i32
    %c0_i32_1 = arith.constant 0 : i32
    return %c0_i32, %c0_i32_0 : i32, i32
  }
  func.func @transform_2(%arg0: i32) -> (i32, i32) {
    %c0_i32 = arith.constant 0 : i32
    %c0_i32_0 = arith.constant 0 : i32
    %c0_i32_1 = arith.constant 0 : i32
    return %c0_i32, %c0_i32_0 : i32, i32
  }
  func.func @transform_3(%arg0: i32) -> (i32, i32) {
    %c0_i32 = arith.constant 0 : i32
    %c0_i32_0 = arith.constant 0 : i32
    %c0_i32_1 = arith.constant 0 : i32
    return %c0_i32, %c0_i32_0 : i32, i32
  }
  func.func @transform_4(%arg0: i32) -> (i32, i32) {
    %c0_i32 = arith.constant 0 : i32
    %c0_i32_0 = arith.constant 0 : i32
    %c0_i32_1 = arith.constant 0 : i32
    return %c0_i32, %c0_i32_0 : i32, i32
  }
  func.func @transform_5(%arg0: i32) -> (i32, i32) {
    %c0_i32 = arith.constant 0 : i32
    %c0_i32_0 = arith.constant 0 : i32
    return %arg0, %c0_i32 : i32, i32
  }
}

</mosaic_0001>

<bundles_post_ra>
// kernel: mplayer_forward.2
= control target key start
LH: loop header
LB: loop body
LE: loop exit
PB: predicated region body
PF: predicated region fallthrough
CT: control target
= control target key end

     0   :  { %v390_v1 = vmov 0   ;;  %v391_v18 = vmov 0.0   ;;  %vm392_vm0 = vmmov 0   ;;  %v50_v19 = vlaneseq  ;;  %s513_s4 = inlined_call_operand.vmem [shape: bf16[128,256], index: 4, kind: input, shape index: {}]   ;;  %s514_s0 = inlined_call_operand.vmem [shape: bf16[16,128], index: 0, kind: input, shape index: {}]   ;;  %s515_s5 = inlined_call_operand.vmem [shape: f32[1,256], index: 5, kind: input, shape index: {}]   ;;  %s516_s1 = inlined_call_operand.vmem [shape: f32[1,16], index: 1, kind: input, shape index: {}]   ;;  %s517_s2 = inlined_call_operand.vmem [shape: s32[1,16], index: 2, kind: input, shape index: {}]   ;;  %s518_s3 = inlined_call_operand.vmem [shape: f32[8,128], index: 3, kind: input, shape index: {}]   ;;  %s519_s6 = inlined_call_operand.vmem [shape: f32[8,128], index: 6, kind: output, shape index: {}]  }
   0x1   :  { %v347_v0 = vld [vmem:[%s513_s4 + $0x4] ss:$8 sps:$4 sm:$0xff]   ;;  %178 = vmatprep.mubr.bf16.mxu0 %v390_v1  ;;  %v349_v2 = vld [vmem:[%s513_s4] ss:$8 sps:$4 sm:$0xff]   ;;  %v350_v3 = vld [vmem:[%s513_s4 + $0x14] ss:$8 sps:$4 sm:$0xff]   ;;  %338 = vmatprep.subr.bf16.mxu1 %v391_v18 }
   0x2   :  { %146 = vmatprep.subr.bf16.mxu0 %v347_v0  ;;  %v352_v4 = vld [vmem:[%s513_s4 + $0x10] ss:$8 sps:$4 sm:$0xff]   ;;  %v353_v5 = vld [vmem:[%s513_s4 + $0x24] ss:$8 sps:$4 sm:$0xff]   ;;  %v355_v6 = vld [vmem:[%s513_s4 + $0x20] ss:$8 sps:$4 sm:$0xff]   ;;  %340 = vmatprep.mubr.msk.bf16.mxu1 %vm392_vm0, %v391_v18 }
   0x3   :  { %147 = vmatpush1.bf16.msra.mxu0 %v349_v2  ;;  %v356_v7 = vld [vmem:[%s513_s4 + $0x34] ss:$8 sps:$4 sm:$0xff]   ;;  %v358_v8 = vld [vmem:[%s513_s4 + $0x30] ss:$8 sps:$4 sm:$0xff]   ;;  %v359_v9 = vld [vmem:[%s513_s4 + $0x44] ss:$8 sps:$4 sm:$0xff]  }
   0x4   :  { %148 = vmatprep.subr.bf16.mxu0 %v350_v3  ;;  %v361_v10 = vld [vmem:[%s513_s4 + $0x40] ss:$8 sps:$4 sm:$0xff]   ;;  %v362_v11 = vld [vmem:[%s513_s4 + $0x54] ss:$8 sps:$4 sm:$0xff]   ;;  %v364_v12 = vld [vmem:[%s513_s4 + $0x50] ss:$8 sps:$4 sm:$0xff]  }
   0x5   :  { %v365_v13 = vld [vmem:[%s513_s4 + $0x64] ss:$8 sps:$4 sm:$0xff]   ;;  %v367_v14 = vld [vmem:[%s513_s4 + $0x60] ss:$8 sps:$4 sm:$0xff]   ;;  %v368_v15 = vld [vmem:[%s513_s4 + $0x74] ss:$8 sps:$4 sm:$0xff]  }
   0x6   :  { %v370_v16 = vld [vmem:[%s513_s4 + $0x70] ss:$8 sps:$4 sm:$0xff]   ;;  %v371_v17 = vld [vmem:[%s514_s0] sm:$0xff]   ;;  %v479_v20 = vshrl.u32 %v50_v19, 7  ;;  %vm265_vm6 = vcmask 130048  }
   0x7   :  { %149 = vmatpush1.bf16.msra.mxu0 %v352_v4  ;;  %v48_v22 = vld [vmem:[%s515_s5] sm:$0x3] }
   0x8   :  { %150 = vmatprep.subr.bf16.mxu0 %v353_v5  ;;  %v56_v21 = vsub.s32 1, %v479_v20  ;;  %v52_v23 = vsub.s32 0, %v479_v20  ;;  %v239_v40 = vld [vmem:[%s516_s1] sm:$0x1] }
   0x9   :  { %v240_v43 = vmul.f32 %v239_v40, %v239_v40  ;;  %v334_v5 = vld [vmem:[%s517_s2] ss:$0 sm:$0xff] }
   0xa   :  { %v57_v24 = vrot.slane %v48_v22, %v56_v21  ;;  %v53_v25 = vrot.slane %v48_v22, %v52_v23  ;;  %vm254_vm4 = vcmp.eq.s32.totalorder %v479_v20, %v334_v5  ;;  %v28_v21 = vld [vmem:[%s518_s3] sm:$0xff] }
   0xb   :  { %151 = vmatpush1.bf16.msra.mxu0 %v355_v6  ;;  %v241_v44 = vmul.f32 -0.055555556, %v240_v43 }
   0xc   :  { %152 = vmatprep.subr.bf16.mxu0 %v356_v7 }
   0xd   :  { %v242_v46 = vmul.f32 1.442695, %v241_v44 }
   0xf   :  { %153 = vmatpush1.bf16.msra.mxu0 %v358_v8 }
  0x10   :  { %154 = vmatprep.subr.bf16.mxu0 %v359_v9 }
  0x13   :  { %155 = vmatpush1.bf16.msra.mxu0 %v361_v10 }
  0x14   :  { %156 = vmatprep.subr.bf16.mxu0 %v362_v11 }
  0x17   :  { %157 = vmatpush1.bf16.msra.mxu0 %v364_v12 }
  0x18   :  { %158 = vmatprep.subr.bf16.mxu0 %v365_v13 }
  0x1b   :  { %159 = vmatpush1.bf16.msra.mxu0 %v367_v14 }
  0x1c   :  { %160 = vmatprep.subr.bf16.mxu0 %v368_v15 }
  0x1f   :  { %161 = vmatpush1.bf16.msra.mxu0 %v370_v16 }
  0x22   :  { %179 = vmatmul.mubr.bf16.vlgmr.msra.gmra.mrb[0].mxu0 %v371_v17 }
  0xf5   :  { %v180_v26 = vpop.f32.mrb[0].mxu0 }
  0xf6   :  { %v182_v27 = vpop.f32.mrb[1].mxu0  ;;  %v181_v30 = vadd.f32 %v180_v26, %v53_v25 }
  0xf7   :  { %v486_v28 = vadd.f32 %v182_v27, %v57_v24  ;;  %v184_v29 = vpop.f32.mrb[2].mxu0 }
  0xf8   :  { %v186_v31 = vpop.f32.mrb[3].mxu0  ;;  %v185_v35 = vadd.f32 %v184_v29, %v53_v25  ;;  %v332_v37 = vmul.f32 -1.442695, %v181_v30 }
  0xf9   :  { %v207_v32 = vand.u32 2147483647, %v486_v28  ;;  %v489_v33 = vadd.f32 %v186_v31, %v57_v24  ;;  %v201_v1 = vmax.f32 %v486_v28, 0.0  ;;  %vm203_vm3 = vcmp.ne.f32.partialorder %v486_v28, %v486_v28 }
  0xfa   :  { %v333_v41 = vmul.f32 -1.442695, %v185_v35 }
  0xfb   :  { %v209_v34 = vsub.f32 0.0, %v207_v32  ;;  %v208_v36 = vand.u32 2147483647, %v489_v33  ;;  %v202_v6 = vmax.f32 %v489_v33, 0.0  ;;  %vm204_vm5 = vcmp.ne.f32.partialorder %v489_v33, %v489_v33 }
  0xfd   :  { %v211_v38 = vmul.f32 1.442695, %v209_v34  ;;  %v210_v39 = vsub.f32 0.0, %v208_v36 }
  0xff   :  { %372 = vpow2.f32 %v211_v38  ;;  %v213_v42 = vmul.f32 1.442695, %v210_v39 }
 0x100   :  { %374 = vpow2.f32 %v332_v37 }
 0x101   :  { %376 = vpow2.f32 %v213_v42 }
 0x102   :  { %378 = vpow2.f32 %v333_v41 }
 0x109   :  { %v373_v45 = vpop.eup %372 }
 0x10a   :  { %v375_v47 = vpop.eup %374  ;;  %v215_v48 = vadd.f32 1.0, %v373_v45  ;;  %v218_v53 = vmul.f32 -0.5, %v373_v45  ;;  %v221_v57 = vand.u32 2147483647, %v373_v45 }
 0x10b   :  { %v377_v49 = vpop.eup %376  ;;  %v195_v52 = vadd.f32 1.0, %v375_v47 }
 0x10c   :  { %380 = vlog2.f32 %v215_v48  ;;  %v224_v50 = vadd.f32 1.0, %v377_v49  ;;  %v379_v51 = vpop.eup %378  ;;  %v227_v55 = vmul.f32 -0.5, %v377_v49  ;;  %v219_v56 = vadd.f32 1.0, %v218_v53 }
 0x10d   :  { %382 = vpow2.f32 %v242_v46  ;;  %v196_v54 = vadd.f32 1.0, %v379_v51  ;;  %v230_v60 = vand.u32 2147483647, %v377_v49  ;;  %vm222_vm1 = vcmp.lt.f32.partialorder %v221_v57, 0.0004427343 }
 0x10e   :  { %384 = vlog2.f32 %v224_v50  ;;  %v228_v58 = vadd.f32 1.0, %v227_v55  ;;  %v220_v63 = vmul.f32 %v373_v45, %v219_v56 }
 0x10f   :  { %386 = vrcp.f32 %v195_v52  ;;  %vm231_vm2 = vcmp.lt.f32.partialorder %v230_v60, 0.0004427343 }
 0x110   :  { %388 = vrcp.f32 %v196_v54  ;;  %v229_v4 = vmul.f32 %v377_v49, %v228_v58 }
 0x116   :  { %v381_v59 = vpop.eup %380 }
 0x117   :  { %v383_v61 = vpop.eup %382  ;;  %v217_v62 = vmul.f32 0.6931472, %v381_v59 }
 0x118   :  { %v385_v0 = vpop.eup %384  ;;  %v259_v8 = vrot.slane %v383_v61, %v52_v23 }
 0x119   :  { %v223_v2 = vsel %vm222_vm1, %v220_v63, %v217_v62  ;;  %v226_v3 = vmul.f32 0.6931472, %v385_v0  ;;  %v387_v10 = vpop.eup %386 }
 0x11a   :  { %v233_v7 = vadd.f32 %v223_v2, %v201_v1  ;;  %v389_v14 = vpop.eup %388  ;;  %v261_v17 = vsel %vm254_vm4, %v259_v8, 0.0 }
 0x11b   :  { %v232_v9 = vsel %vm231_vm2, %v229_v4, %v226_v3  ;;  %v262_v19 = vpack.c.bf16 %v261_v17, %v261_v17 }
 0x11c   :  { %v234_v11 = vadd.f32 %v232_v9, %v202_v6  ;;  %v235_v12 = vsel %vm203_vm3, %v486_v28, %v233_v7 }
 0x11d   :  { %v237_v13 = vmul.f32 %v387_v10, %v235_v12 }
 0x11e   :  { %v236_v15 = vsel %vm204_vm5, %v489_v33, %v234_v11 }
 0x11f   :  { %v238_v16 = vmul.f32 %v389_v14, %v236_v15 }
 0x121   :  { %v264_v18 = vpack.c.bf16 %v238_v16, %v237_v13 }
 0x123   :  { %339 = vmatpush3.bf16.msra.mxu1 %v264_v18 }
 0x126   :  { %341 = vmatmul.mubr.msk.bf16.vlgmr.msra.gmra.mrb[0].mxu1 %vm265_vm6, %v262_v19 }
 0x1f9   :  { %v303_v22 = vpop.f32.mrb[0].mxu1 }
 0x1fa   :  { %v309_v20 = vadd.f32 %v303_v22, %v28_v21  ;;  %v342_v23 = vpop.f32.mrb[1].mxu1 }
 0x1fb   :  { %v306_v24 = vpop.f32.mrb[2].mxu1 }
 0x1fc   :  { %310 = vst [vmem:[%s519_s6] sm:$0xff] %v309_v20  ;;  %v343_v25 = vpop.f32.mrb[3].mxu1 }

// kernel: mplayer_forward.3
= control target key start
LH: loop header
LB: loop body
LE: loop exit
PB: predicated region body
PF: predicated region fallthrough
CT: control target
= control target key end

     0   :  { %v444_v1 = vmov 0.0   ;;  %vm445_vm0 = vmmov 0   ;;  %s548_s0 = inlined_call_operand.vmem [shape: bf16[16,128], index: 0, kind: input, shape index: {}]   ;;  %s549_s1 = inlined_call_operand.vmem [shape: bf16[128,128], index: 1, kind: input, shape index: {}]   ;;  %s550_s2 = inlined_call_operand.vmem [shape: f32[1,128], index: 2, kind: input, shape index: {}]   ;;  %s551_s3 = inlined_call_operand.vmem [shape: bf16[128,128], index: 3, kind: input, shape index: {}]   ;;  %s552_s4 = inlined_call_operand.vmem [shape: f32[1,128], index: 4, kind: input, shape index: {}]   ;;  %s553_s5 = inlined_call_operand.hbm [shape: f32[16,128], index: 5, kind: output, shape index: {}]  }
   0x1   :  { %v387_v0 = vld [vmem:[%s549_s1] sm:$0xff]   ;;  %342 = vmatprep.subr.bf16.mxu0 %v444_v1  ;;  %362 = vmatprep.subr.bf16.mxu1 %v444_v1  ;;  %v388_v2 = vld [vmem:[%s549_s1 + $0x8] sm:$0xff]   ;;  %v389_v3 = vld [vmem:[%s549_s1 + $0x10] sm:$0xff]  }
   0x2   :  { %343 = vmatpush3.bf16.msra.mxu0 %v387_v0  ;;  %358 = vmatprep.mubr.msk.bf16.mxu0 %vm445_vm0, %v444_v1  ;;  %v390_v4 = vld [vmem:[%s549_s1 + $0x18] sm:$0xff]   ;;  %v391_v5 = vld [vmem:[%s549_s1 + $0x20] sm:$0xff]  }
   0x3   :  { %344 = vmatprep.subr.bf16.mxu0 %v444_v1  ;;  %378 = vmatprep.mubr.msk.bf16.mxu1 %vm445_vm0, %v444_v1 }
   0x6   :  { %345 = vmatpush3.bf16.msra.mxu0 %v388_v2 }
   0x7   :  { %346 = vmatprep.subr.bf16.mxu0 %v444_v1 }
   0xa   :  { %347 = vmatpush3.bf16.msra.mxu0 %v389_v3 }
   0xb   :  { %348 = vmatprep.subr.bf16.mxu0 %v444_v1 }
   0xe   :  { %349 = vmatpush3.bf16.msra.mxu0 %v390_v4 }
   0xf   :  { %10 = vsyncpa [#allocation3], 0  ;;  %350 = vmatprep.subr.bf16.mxu0 %v444_v1  ;;  %v392_v6 = vld [vmem:[%s549_s1 + $0x28] sm:$0xff]   ;;  %v393_v7 = vld [vmem:[%s549_s1 + $0x30] sm:$0xff]   ;;  %s446_s27 = smov [#allocation2]  }
  0x10   :  { %v394_v8 = vld [vmem:[%s549_s1 + $0x38] sm:$0xff]   ;;  %v395_v9 = vld [vmem:[%s548_s0] sm:$0xff]   ;;  %v397_v11 = vld [vmem:[%s551_s3 + $0x8] sm:$0xff]   ;;  %s290_s28 = sshll.u32 %s446_s27, 4  ;;  %s291_s28 = int_to_ptr.vmem [resolvable:$true] %s290_s28 }
  0x11   :  { %v396_v10 = vld [vmem:[%s551_s3] sm:$0xff]   ;;  %v398_v12 = vld [vmem:[%s551_s3 + $0x10] sm:$0xff]   ;;  %v399_v13 = vld [vmem:[%s551_s3 + $0x18] sm:$0xff]   ;;  %p425_p1 = scmp.lt.s32.totalorder %s291_s28, %s291_s28 }
  0x12   :  { %351 = vmatpush3.bf16.msra.mxu0 %v391_v5  ;;  %363 = vmatpush3.bf16.msra.mxu1 %v396_v10  ;;  %v400_v14 = vld [vmem:[%s551_s3 + $0x20] sm:$0xff]   ;;  %v401_v15 = vld [vmem:[%s551_s3 + $0x28] sm:$0xff]   ;;  %v402_v16 = vld [vmem:[%s551_s3 + $0x30] sm:$0xff]  }
  0x13   :  { %352 = vmatprep.subr.bf16.mxu0 %v444_v1  ;;  %364 = vmatprep.subr.bf16.mxu1 %v444_v1  ;;  %v403_v17 = vld [vmem:[%s551_s3 + $0x38] sm:$0xff]   ;;  %v301_v18 = vld [vmem:[%s550_s2] ss:$0 sm:$0xff] }
  0x14   :  { %v313_v36 = vld [vmem:[%s552_s4] ss:$0 sm:$0xff]  ;;  %s420_s4 = scalar_lea.vmem %s291_s28, 256 }
  0x15   :  { %p421_p0 = scmp.ne.s32.totalorder %s291_s28, %s420_s4  ;;  %p426_p2 = scmp.lt.s32.totalorder %s420_s4, %s420_s4 }
  0x16   :  { %353 = vmatpush3.bf16.msra.mxu0 %v392_v6  ;;  %365 = vmatpush3.bf16.msra.mxu1 %v397_v11 }
  0x17   :  { %354 = vmatprep.subr.bf16.mxu0 %v444_v1  ;;  %366 = vmatprep.subr.bf16.mxu1 %v444_v1  ;;  %p427_p3 = por %p426_p2, %p425_p1 }
  0x19   :  { %p428_p4 = pnand %p427_p3, %p421_p0 }
  0x1a   :  { %355 = vmatpush3.bf16.msra.mxu0 %v393_v7  ;;  %367 = vmatpush3.bf16.msra.mxu1 %v398_v12 }
  0x1b   :  { %356 = vmatprep.subr.bf16.mxu0 %v444_v1  ;;  %368 = vmatprep.subr.bf16.mxu1 %v444_v1 }
  0x1e   :  { %357 = vmatpush3.bf16.msra.mxu0 %v394_v8  ;;  %369 = vmatpush3.bf16.msra.mxu1 %v399_v13 }
  0x1f   :  { %370 = vmatprep.subr.bf16.mxu1 %v444_v1 }
  0x21   :  { %359 = vmatmul.mubr.bf16.vlgmr.msra.gmra.mrb[0].mxu0 %v395_v9 }
  0x22   :  { %371 = vmatpush3.bf16.msra.mxu1 %v400_v14 }
  0x23   :  { %372 = vmatprep.subr.bf16.mxu1 %v444_v1 }
  0x26   :  { %373 = vmatpush3.bf16.msra.mxu1 %v401_v15 }
  0x27   :  { %374 = vmatprep.subr.bf16.mxu1 %v444_v1 }
  0x2a   :  { %375 = vmatpush3.bf16.msra.mxu1 %v402_v16 }
  0x2b   :  { %376 = vmatprep.subr.bf16.mxu1 %v444_v1 }
  0x2e   :  { %377 = vmatpush3.bf16.msra.mxu1 %v403_v17 }
  0xf4   :  { %v135_v19 = vpop.f32.mrb[0].mxu0 }
  0xf5   :  { %v136_v20 = vadd.f32 %v301_v18, %v135_v19  ;;  %v360_v21 = vpop.f32.mrb[1].mxu0 }
  0xf6   :  { %v138_v22 = vpop.f32.mrb[2].mxu0 }
  0xf7   :  { %v311_v23 = vmul.f32 -1.442695, %v136_v20  ;;  %v139_v24 = vadd.f32 %v301_v18, %v138_v22  ;;  %v361_v25 = vpop.f32.mrb[3].mxu0 }
  0xf9   :  { %404 = vpow2.f32 %v311_v23  ;;  %v312_v26 = vmul.f32 -1.442695, %v139_v24 }
  0xfb   :  { %406 = vpow2.f32 %v312_v26 }
 0x103   :  { %v405_v27 = vpop.eup %404 }
 0x104   :  { %v148_v28 = vadd.f32 1.0, %v405_v27 }
 0x105   :  { %v407_v29 = vpop.eup %406 }
 0x106   :  { %408 = vrcp.f32 %v148_v28  ;;  %v149_v30 = vadd.f32 1.0, %v407_v29 }
 0x108   :  { %410 = vrcp.f32 %v149_v30 }
 0x110   :  { %v409_v31 = vpop.eup %408 }
 0x111   :  { %v154_v33 = vmul.f32 %v409_v31, %v136_v20 }
 0x112   :  { %v411_v32 = vpop.eup %410 }
 0x113   :  { %v155_v34 = vmul.f32 %v411_v32, %v139_v24 }
 0x115   :  { %v156_v35 = vpack.c.bf16 %v155_v34, %v154_v33 }
 0x117   :  { %379 = vmatmul.mubr.bf16.vlgmr.msra.gmra.mrb[0].mxu1 %v156_v35 }
 0x1ea   :  { %v262_v37 = vpop.f32.mrb[0].mxu1 }
 0x1eb   :  { %v263_v38 = vadd.f32 %v313_v36, %v262_v37  ;;  %v380_v39 = vpop.f32.mrb[1].mxu1 }
 0x1ec   :  { %v265_v40 = vpop.f32.mrb[2].mxu1 }
 0x1ed   :  { %v322_v41 = vmul.f32 -1.442695, %v263_v38  ;;  %v266_v42 = vadd.f32 %v313_v36, %v265_v40  ;;  %v381_v43 = vpop.f32.mrb[3].mxu1 }
 0x1ef   :  { %412 = vpow2.f32 %v322_v41  ;;  %v323_v44 = vmul.f32 -1.442695, %v266_v42 }
 0x1f1   :  { %414 = vpow2.f32 %v323_v44 }
 0x1f9   :  { %v413_v45 = vpop.eup %412 }
 0x1fa   :  { %v275_v46 = vadd.f32 1.0, %v413_v45 }
 0x1fb   :  { %v415_v47 = vpop.eup %414 }
 0x1fc   :  { %416 = vrcp.f32 %v275_v46  ;;  %v276_v48 = vadd.f32 1.0, %v415_v47 }
 0x1fe   :  { %418 = vrcp.f32 %v276_v48 }
 0x206   :  { %v417_v49 = vpop.eup %416 }
 0x207   :  { %v281_v50 = vmul.f32 %v417_v49, %v263_v38 }
 0x208   :  { %v419_v51 = vpop.eup %418 }
 0x209   :  { %283 = vst [vmem:[#allocation2] sm:$0xff] %v281_v50  ;;  %v282_v52 = vmul.f32 %v419_v51, %v266_v42 }
 0x20b   :  { %284 = vst [vmem:[#allocation2 + $0x8] sm:$0xff] %v282_v52 }
 0x20c   :  { %431 = shalt.err (!%p428_p4)
}
 0x20d   :  { %s432_s6 = scalar_lea.hbm %s553_s5, 256 }
 0x20e   :  { %p433_p5 = scmp.ne.s32.totalorder %s553_s5, %s432_s6  ;;  %p436_p6 = scmp.lt.u32.totalorder %s432_s6, %s553_s5 }
 0x210   :  { %p438_p7 = pnand %p436_p6, %p433_p5 }
 0x212   :  { %441 = shalt.err (!%p438_p7)
}
 0x213   :  { %s447_s11 = smov 128   ;;  %s448_s12 = smov 8  }
 0x214   :  { %296 = dma.vmem_to_hbm [thread:$0]  %s291_s28, 256, %s553_s5, [#allocation3], %s447_s11, %s447_s11, %s448_s12  }
 0x215   :  { %442 = dma.done.wait [#allocation3], 256  }
 0x216   :  { %443 = vsyncadd [#allocation3], 4294967040 }
 0x217   :  { %300 = vsyncpa [#allocation3], 1 }

</bundles_post_ra>
